<compile_context>
chip_gen: v5e
topology: v5e:2x2
jax: 0.10.0
libtpu: 0.0.40
codegen_flags: <defaults>
</compile_context>

<pallas_src>
from functools import partial

import jax
import jax.numpy as jnp
from jax.experimental import pallas as pl
from jax.experimental.pallas import tpu as pltpu


def _pick_tile(dim, pref):
    """Use the preferred tile if it divides the dim, else fall back to full dim."""
    return pref if dim % pref == 0 else dim


def _bf16_eup_ok():
    """bf16 exp only where the EUP/VPU handle bf16 (v6e / v7x); f32 elsewhere."""
    try:
        kind = jax.devices()[0].device_kind.lower()
    except Exception:
        return False
    return any(tag in kind for tag in ("v6", "v7", "7x"))


# ---------------------------------------------------------------------------
# Tiled matmul (no bias):  y = x @ w        (x:(M,K), w:(K,N))
# ---------------------------------------------------------------------------
def _matmul_kernel(x_ref, w_ref, o_ref, acc_ref):
    @pl.when(pl.program_id(2) == 0)
    def _():
        acc_ref[...] = jnp.zeros_like(acc_ref)

    acc_ref[...] += jnp.dot(x_ref[...], w_ref[...],
                            preferred_element_type=jnp.float32)

    @pl.when(pl.program_id(2) == pl.num_programs(2) - 1)
    def _():
        o_ref[...] = acc_ref[...].astype(o_ref.dtype)


def pallas_matmul(x, w, *, out_dtype, tm=256, tn=256, tk=512):
    M, K = x.shape
    Kw, N = w.shape
    assert K == Kw
    tm = _pick_tile(M, tm)
    tn = _pick_tile(N, tn)
    tk = _pick_tile(K, tk)
    return pl.pallas_call(
        _matmul_kernel,
        out_shape=jax.ShapeDtypeStruct((M, N), out_dtype),
        grid_spec=pltpu.PrefetchScalarGridSpec(
            num_scalar_prefetch=0,
            grid=(M // tm, N // tn, K // tk),
            in_specs=[
                pl.BlockSpec((tm, tk), lambda i, j, k: (i, k)),
                pl.BlockSpec((tk, tn), lambda i, j, k: (k, j)),
            ],
            out_specs=pl.BlockSpec((tm, tn), lambda i, j, k: (i, j)),
            scratch_shapes=[pltpu.VMEM((tm, tn), jnp.float32)],
        ),
        compiler_params=pltpu.CompilerParams(
            dimension_semantics=("parallel", "parallel", "arbitrary"),
            vmem_limit_bytes=48 * 1024 * 1024,
        ),
    )(x, w)


# ---------------------------------------------------------------------------
# Flash-style attention core with fused output projection.
#   qkv   : (B, N, 3C) bf16, column layout [q | k | v], heads contiguous inside
#           each C-wide block (PyTorch reshape(B,N,3,H,D) layout).
#   w_proj: (C, C) bf16 (held VMEM-resident), b_proj: (1, C) f32.
# ---------------------------------------------------------------------------
def _flash_attn_proj_kernel(q_ref, k_ref, v_ref, wp_ref, bp_ref, o_ref,
                            m_ref, l_ref, acc_ref,
                            *, num_heads, scale, exp_dtype):
    ki = pl.program_id(2)

    @pl.when(ki == 0)
    def _():
        m_ref[...] = jnp.full_like(m_ref, -jnp.inf)
        l_ref[...] = jnp.zeros_like(l_ref)
        acc_ref[...] = jnp.zeros_like(acc_ref)

    q = q_ref[0]          # (tq, C) bf16
    k = k_ref[0]          # (tk, C) bf16
    v = v_ref[0]          # (tk, C) bf16
    _, C = q.shape
    D = C // num_heads

    # Read running stats ONCE per grid step (full-width loads). m/l are kept
    # replicated across each head's D lanes so all scratch traffic is lane-dense.
    m_prev = m_ref[...]
    l_prev = l_ref[...]
    acc_prev = acc_ref[...]

    m_parts, l_parts, acc_parts = [], [], []
    for h in range(num_heads):            # static unroll; lane slices, no XLU transpose
        sl = slice(h * D, (h + 1) * D)
        qh, kh, vh = q[:, sl], k[:, sl], v[:, sl]

        # (tq, tk) f32 scores; softmax scale applied here (VPU mul, hidden under exp).
        s = jax.lax.dot_general(qh, kh, (((1,), (1,)), ((), ())),
                                preferred_element_type=jnp.float32) * scale

        m_prev_h = m_prev[:, sl]                              # (tq, D) replicated
        s_max = jnp.max(s, axis=-1, keepdims=True)            # (tq, 1)
        m_new_h = jnp.maximum(m_prev_h, s_max)                # (tq, D) replicated
        alpha_h = jnp.exp(m_prev_h - m_new_h)                 # (tq, D) replicated

        # Probabilities: bf16 exp on v6e/v7x, f32 on v5e. l / acc stay f32.
        p = jnp.exp((s - m_new_h[:, :1]).astype(exp_dtype))   # (tq, tk)
        l_parts.append(alpha_h * l_prev[:, sl] +
                       jnp.sum(p.astype(jnp.float32), axis=-1, keepdims=True))
        pv = jnp.dot(p.astype(v.dtype), vh,
                     preferred_element_type=jnp.float32)      # (tq, D)
        acc_parts.append(alpha_h * acc_prev[:, sl] + pv)
        m_parts.append(m_new_h)

    # ONE full-lane-width store per scratch buffer.
    m_ref[...] = jnp.concatenate(m_parts, axis=-1)
    l_ref[...] = jnp.concatenate(l_parts, axis=-1)
    acc_ref[...] = jnp.concatenate(acc_parts, axis=-1)

    @pl.when(ki == pl.num_programs(2) - 1)
    def _():
        # l is replicated per-head -> full-slab VPU normalize, then fused proj.
        ctx = acc_ref[...] * pl.reciprocal(l_ref[...], approx=True)   # (tq, C) f32
        y = jnp.dot(ctx.astype(wp_ref.dtype), wp_ref[...],
                    preferred_element_type=jnp.float32)               # (tq, C) f32
        o_ref[0] = (y + bp_ref[...]).astype(o_ref.dtype)


def flash_attention_proj(qkv, w_proj, b_proj, *, num_heads, scale, out_dtype,
                         tq=256, tk=512):
    B, N, C3 = qkv.shape
    C = C3 // 3
    tq = _pick_tile(N, tq)
    tk = _pick_tile(N, tk)
    exp_dtype = jnp.bfloat16 if _bf16_eup_ok() else jnp.float32
    kernel = partial(_flash_attn_proj_kernel, num_heads=num_heads, scale=scale,
                     exp_dtype=exp_dtype)
    return pl.pallas_call(
        kernel,
        out_shape=jax.ShapeDtypeStruct((B, N, C), out_dtype),
        grid_spec=pltpu.PrefetchScalarGridSpec(
            num_scalar_prefetch=0,
            grid=(B, N // tq, N // tk),
            in_specs=[
                # q/k/v selected from the packed qkv tensor via column-block index.
                pl.BlockSpec((1, tq, C), lambda b, qi, ki: (b, qi, 0)),   # Q cols
                pl.BlockSpec((1, tk, C), lambda b, qi, ki: (b, ki, 1)),   # K cols
                pl.BlockSpec((1, tk, C), lambda b, qi, ki: (b, ki, 2)),   # V cols
                pl.BlockSpec((C, C), lambda b, qi, ki: (0, 0)),           # w_proj resident
                pl.BlockSpec((1, C), lambda b, qi, ki: (0, 0)),           # b_proj resident
            ],
            out_specs=pl.BlockSpec((1, tq, C), lambda b, qi, ki: (b, qi, 0)),
            scratch_shapes=[
                pltpu.VMEM((tq, C), jnp.float32),   # running max  m (per-head replicated)
                pltpu.VMEM((tq, C), jnp.float32),   # running sum  l (per-head replicated)
                pltpu.VMEM((tq, C), jnp.float32),   # output accumulator
            ],
        ),
        compiler_params=pltpu.CompilerParams(
            dimension_semantics=("parallel", "parallel", "arbitrary"),
            vmem_limit_bytes=48 * 1024 * 1024,
        ),
    )(qkv, qkv, qkv, w_proj, b_proj)


# ---------------------------------------------------------------------------
# Full module forward
# ---------------------------------------------------------------------------
def attention_forward(x, w_qkv, w_proj, b_proj, *, num_heads, tq=256, tk=512):
    """x: (B, N, C); w_qkv: (C, 3C); w_proj: (C, C); b_proj: (1, C)."""
    B, N, C = x.shape
    assert C % num_heads == 0
    head_dim = C // num_heads
    scale = head_dim ** (-0.5)

    # bf16 MXU operands; accumulation stays f32 inside the kernels.
    xb = x.astype(jnp.bfloat16).reshape(B * N, C)
    wqkv_b = w_qkv.astype(jnp.bfloat16)
    wproj_b = w_proj.astype(jnp.bfloat16)

    # 1) QKV projection (Pallas tiled matmul, no bias: qkv_bias=False).
    qkv = pallas_matmul(xb, wqkv_b, out_dtype=jnp.bfloat16).reshape(B, N, 3 * C)

    # 2+3) Flash attention core with fused output projection (+bias).
    y = flash_attention_proj(qkv, wproj_b, b_proj.astype(jnp.float32),
                             num_heads=num_heads, scale=scale,
                             out_dtype=x.dtype, tq=tq, tk=tk)
    return y


def attention_reference(x, w_qkv, w_proj, b_proj, *, num_heads):
    B, N, C = x.shape
    D = C // num_heads
    scale = D ** (-0.5)
    qkv = (x @ w_qkv).reshape(B, N, 3, num_heads, D).transpose(2, 0, 3, 1, 4)
    q, k, v = qkv[0], qkv[1], qkv[2]
    attn = (q @ jnp.swapaxes(k, -2, -1)) * scale
    attn = jax.nn.softmax(attn, axis=-1)
    out = jnp.swapaxes(attn @ v, 1, 2).reshape(B, N, C)
    return out @ w_proj + b_proj[0]


if __name__ == "__main__":
    B, N, C = 2, 32, 128          # C multiple of 128 -> q/k/v column blocks are lane-aligned
    num_heads = 8                  # head_dim = 16

    key = jax.random.PRNGKey(0)
    kx, kq, kp, kb = jax.random.split(key, 4)

    x = jax.random.normal(kx, (B, N, C), dtype=jnp.float32)
    # Deterministic synthetic parameters (qkv_bias=False per module default).
    w_qkv = jax.random.normal(kq, (C, 3 * C), dtype=jnp.float32) * 0.02
    w_proj = jax.random.normal(kp, (C, C), dtype=jnp.float32) * 0.02
    b_proj = jax.random.normal(kb, (1, C), dtype=jnp.float32) * 0.02

    # Small tiles here so the grid has multiple K steps (2 per query tile) and the
    # online-softmax rescaling path (alpha / running m,l) is actually exercised.
    out = attention_forward(x, w_qkv, w_proj, b_proj, num_heads=num_heads,
                            tq=16, tk=16)
    out = jax.block_until_ready(out)

    ref = attention_reference(x, w_qkv, w_proj, b_proj, num_heads=num_heads)
    assert out.shape == (B, N, C)
    # bf16 MXU operands (+ bf16 exp on v6e/v7x) + approx reciprocal -> loosened tolerance.
    assert jnp.allclose(out, ref, rtol=2e-2, atol=2e-2), "mismatch vs reference"

    print("KERNEL_OK")
</pallas_src>

<mosaic_0001>
module attributes {stable_mosaic.version = 11 : i64} {
  func.func @_matmul_kernel(%arg0: i32, %arg1: i32, %arg2: i32, %arg3: memref<64x128xbf16, #tpu.memory_space<vmem>>, %arg4: memref<128x384xbf16, #tpu.memory_space<vmem>>, %arg5: memref<64x384xbf16, #tpu.memory_space<vmem>>, %arg6: memref<64x384xf32, #tpu.memory_space<vmem>>) attributes {dimension_semantics = [#tpu.dimension_semantics<parallel>, #tpu.dimension_semantics<parallel>, #tpu.dimension_semantics<arbitrary>], iteration_bounds = array<i64: 1, 1, 1>, scalar_prefetch = 0 : i64, scratch_operands = 1 : i64, tpu.core_type = #tpu.core_type<tc>, window_params = [{transform_indices = @transform_0, window_bounds = array<i64: 64, 128>}, {transform_indices = @transform_1, window_bounds = array<i64: 128, 384>}, {transform_indices = @transform_2, window_bounds = array<i64: 64, 384>}]} {
    %c0_i32 = arith.constant 0 : i32
    %0 = arith.cmpi eq, %arg2, %c0_i32 : i32
    %1 = arith.extui %0 : i1 to i32
    %c0_i32_0 = arith.constant 0 : i32
    %2 = arith.cmpi ne, %1, %c0_i32_0 : i32
    scf.if %2 {
      %cst_10 = arith.constant 0.000000e+00 : f32
      %12 = vector.broadcast %cst_10 : f32 to vector<64x384xf32>
      %c0_11 = arith.constant 0 : index
      %c0_12 = arith.constant 0 : index
      %13 = vector.load %arg6[%c0_11, %c0_12] : memref<64x384xf32, #tpu.memory_space<vmem>>, vector<64x384xf32>
      tpu.vector_store %arg6[%c0_11, %c0_12], %12 {strides = array<i32>} : memref<64x384xf32, #tpu.memory_space<vmem>>, vector<64x384xf32>,
    } else {
    }
    %c0 = arith.constant 0 : index
    %c0_1 = arith.constant 0 : index
    %3 = vector.load %arg6[%c0, %c0_1] : memref<64x384xf32, #tpu.memory_space<vmem>>, vector<64x384xf32>
    %c0_2 = arith.constant 0 : index
    %c0_3 = arith.constant 0 : index
    %4 = vector.load %arg3[%c0_2, %c0_3] : memref<64x128xbf16, #tpu.memory_space<vmem>>, vector<64x128xbf16>
    %c0_4 = arith.constant 0 : index
    %c0_5 = arith.constant 0 : index
    %5 = vector.load %arg4[%c0_4, %c0_5] : memref<128x384xbf16, #tpu.memory_space<vmem>>, vector<128x384xbf16>
    %cst = arith.constant dense<0.000000e+00> : vector<64x384xf32>
    %6 = tpu.matmul %4, %5, %cst {dimension_numbers = #tpu.dot_dimension_numbers<[1], [0], [0], [1], [0, 0, 1, 1], [], []>} : vector<64x128xbf16>, vector<128x384xbf16>, vector<64x384xf32> -> vector<64x384xf32>
    %7 = arith.addf %3, %6 : vector<64x384xf32>
    %c0_6 = arith.constant 0 : index
    %c0_7 = arith.constant 0 : index
    %8 = vector.load %arg6[%c0_6, %c0_7] : memref<64x384xf32, #tpu.memory_space<vmem>>, vector<64x384xf32>
    tpu.vector_store %arg6[%c0_6, %c0_7], %7 {strides = array<i32>} : memref<64x384xf32, #tpu.memory_space<vmem>>, vector<64x384xf32>,
    %c0_i32_8 = arith.constant 0 : i32
    %9 = arith.cmpi eq, %arg2, %c0_i32_8 : i32
    %10 = arith.extui %9 : i1 to i32
    %c0_i32_9 = arith.constant 0 : i32
    %11 = arith.cmpi ne, %10, %c0_i32_9 : i32
    scf.if %11 {
      %c0_10 = arith.constant 0 : index
      %c0_11 = arith.constant 0 : index
      %12 = vector.load %arg6[%c0_10, %c0_11] : memref<64x384xf32, #tpu.memory_space<vmem>>, vector<64x384xf32>
      %13 = arith.truncf %12 : vector<64x384xf32> to vector<64x384xbf16>
      %c0_12 = arith.constant 0 : index
      %c0_13 = arith.constant 0 : index
      %14 = vector.load %arg5[%c0_12, %c0_13] : memref<64x384xbf16, #tpu.memory_space<vmem>>, vector<64x384xbf16>
      tpu.vector_store %arg5[%c0_12, %c0_13], %13 {strides = array<i32>} : memref<64x384xbf16, #tpu.memory_space<vmem>>, vector<64x384xbf16>,
    } else {
    }
    return
  }
  func.func @transform_0(%arg0: i32, %arg1: i32, %arg2: i32) -> (i32, i32) {
    %c0_i32 = arith.constant 0 : i32
    return %arg0, %arg2 : i32, i32
  }
  func.func @transform_1(%arg0: i32, %arg1: i32, %arg2: i32) -> (i32, i32) {
    %c0_i32 = arith.constant 0 : i32
    return %arg2, %arg1 : i32, i32
  }
  func.func @transform_2(%arg0: i32, %arg1: i32, %arg2: i32) -> (i32, i32) {
    %c0_i32 = arith.constant 0 : i32
    return %arg0, %arg1 : i32, i32
  }
}

</mosaic_0001>

<bundles_post_ra>
// kernel: tpu_custom_call.1
= control target key start
LH: loop header
LB: loop body
LE: loop exit
PB: predicated region body
PF: predicated region fallthrough
CT: control target
= control target key end

     0   :  { %7 = vsyncpa [#allocation4], 0  ;;  %s772_s0 = inlined_call_operand.hbm [shape: bf16[64,128], index: 0, kind: input, shape index: {}]   ;;  %s773_s1 = inlined_call_operand.hbm [shape: bf16[128,384], index: 1, kind: input, shape index: {}]   ;;  %s774_s2 = inlined_call_operand.hbm [shape: bf16[64,384], index: 2, kind: output, shape index: {}]  }
   0x1   :  { %8 = vsyncpa [#allocation7], 0 }
   0x2   :  { %9 = vsyncpa [#allocation5], 0  ;;  %s14_s11 = sshll.u32 %s772_s0, 4  ;;  %s735_s12 = smov [#allocation3]   ;;  %s15_s11 = int_to_ptr.hbm [resolvable:$true] %s14_s11 }
   0x3   :  { %s16_s13 = sshll.u32 %s735_s12, 4  ;;  %s27_s16 = sshll.u32 %s773_s1, 4  ;;  %s17_s13 = int_to_ptr.vmem [resolvable:$true] %s16_s13  ;;  %s28_s16 = int_to_ptr.hbm [resolvable:$true] %s27_s16 }
   0x4   :  { %s736_s17 = smov 64   ;;  %s737_s18 = smov 4  }
   0x5   :  { %22 = dma.hbm_to_vmem [thread:$0]  %s15_s11, 512, %s17_s13, [#allocation4], %s736_s17, %s736_s17, %s737_s18  }
   0x6   :  { %s738_s19 = smov [#allocation6]   ;;  %s739_s21 = smov 192  }
   0x7   :  { %s29_s20 = sshll.u32 %s738_s19, 4  ;;  %s740_s22 = smov 12   ;;  %s30_s20 = int_to_ptr.vmem [resolvable:$true] %s29_s20 }
   0x8   :  { %35 = dma.hbm_to_vmem [thread:$0]  %s28_s16, 3072, %s30_s20, [#allocation7], %s739_s21, %s739_s21, %s740_s22  }
   0x9   :  { %729 = dma.done.wait [#allocation4], 512  }
   0xa   :  { %730 = vsyncadd [#allocation4], 4294966784 }
   0xb   :  { %731 = dma.done.wait [#allocation7], 3072  }
   0xc   :  { %732 = vsyncadd [#allocation7], 4294964224  ;;  %v604_v0 = vld [vmem:[#allocation6 + $0xa8] sm:$0xf]  ;;  %v640_v1 = vld [vmem:[#allocation6 + $0xb0] sm:$0xf0] }
   0xd   :  { %v639_v2 = vld [vmem:[#allocation6 + $0xac] sm:$0xf]  ;;  %v605_v3 = vor.u32 %v640_v1, %v604_v0  ;;  %v606_v4 = vld [vmem:[#allocation6 + $0xb4] sm:$0xf0]  ;;  %v612_v5 = vld [vmem:[#allocation6 + $0xb0] sm:$0xf] }
   0xe   :  { %v641_v6 = vld [vmem:[#allocation6 + $0xb8] sm:$0xf0]  ;;  %v609_v7 = vor.u32 %v639_v2, %v606_v4  ;;  %v592_v9 = vld [vmem:[#allocation6 + $0x90] sm:$0xf]  ;;  %v636_v11 = vld [vmem:[#allocation6 + $0x94] sm:$0xf] }
   0xf   :  { %v613_v8 = vor.u32 %v641_v6, %v612_v5  ;;  %v637_v10 = vld [vmem:[#allocation6 + $0x98] sm:$0xf0]  ;;  %288 = vmatpush.bf16.msra.mxu0 %v605_v3  ;;  %v594_v13 = vld [vmem:[#allocation6 + $0x9c] sm:$0xf0]  ;;  %v600_v14 = vld [vmem:[#allocation6 + $0x98] sm:$0xf]  ;;  %642 = vmatpush.bf16.msra.mxu3 %v605_v3 }
  0x10   :  { %v593_v12 = vor.u32 %v637_v10, %v592_v9  ;;  %v638_v15 = vld [vmem:[#allocation6 + $0xa0] sm:$0xf0]  ;;  %317 = vmatpush.bf16.msra.mxu1 %v609_v7  ;;  %v597_v16 = vor.u32 %v636_v11, %v594_v13  ;;  %v580_v18 = vld [vmem:[#allocation6 + $0x78] sm:$0xf]  ;;  %v633_v20 = vld [vmem:[#allocation6 + $0x7c] sm:$0xf] }
  0x11   :  { %346 = vmatpush.bf16.msra.mxu2 %v613_v8  ;;  %v601_v17 = vor.u32 %v638_v15, %v600_v14  ;;  %v634_v19 = vld [vmem:[#allocation6 + $0x80] sm:$0xf0]  ;;  %v582_v21 = vld [vmem:[#allocation6 + $0x84] sm:$0xf0]  ;;  %v588_v22 = vld [vmem:[#allocation6 + $0x80] sm:$0xf] }
  0x12   :  { %v635_v23 = vld [vmem:[#allocation6 + $0x88] sm:$0xf0]  ;;  %v581_v24 = vor.u32 %v634_v19, %v580_v18  ;;  %v585_v25 = vor.u32 %v633_v20, %v582_v21  ;;  %v568_v27 = vld [vmem:[#allocation6 + $0x60] sm:$0xf]  ;;  %v630_v29 = vld [vmem:[#allocation6 + $0x64] sm:$0xf] }
  0x13   :  { %289 = vmatpush.bf16.msra.mxu0 %v593_v12  ;;  %643 = vmatpush.bf16.msra.mxu3 %v593_v12  ;;  %v589_v26 = vor.u32 %v635_v23, %v588_v22  ;;  %v631_v28 = vld [vmem:[#allocation6 + $0x68] sm:$0xf0]  ;;  %v570_v30 = vld [vmem:[#allocation6 + $0x6c] sm:$0xf0]  ;;  %v576_v31 = vld [vmem:[#allocation6 + $0x68] sm:$0xf] }
  0x14   :  { %318 = vmatpush.bf16.msra.mxu1 %v597_v16  ;;  %v632_v32 = vld [vmem:[#allocation6 + $0x70] sm:$0xf0]  ;;  %v569_v33 = vor.u32 %v631_v28, %v568_v27  ;;  %v573_v34 = vor.u32 %v630_v29, %v570_v30  ;;  %v556_v36 = vld [vmem:[#allocation6 + $0x48] sm:$0xf]  ;;  %v627_v38 = vld [vmem:[#allocation6 + $0x4c] sm:$0xf] }
  0x15   :  { %347 = vmatpush.bf16.msra.mxu2 %v601_v17  ;;  %v577_v35 = vor.u32 %v632_v32, %v576_v31  ;;  %v628_v37 = vld [vmem:[#allocation6 + $0x50] sm:$0xf0]  ;;  %v558_v39 = vld [vmem:[#allocation6 + $0x54] sm:$0xf0]  ;;  %v564_v40 = vld [vmem:[#allocation6 + $0x50] sm:$0xf] }
  0x16   :  { %v629_v41 = vld [vmem:[#allocation6 + $0x58] sm:$0xf0]  ;;  %v557_v42 = vor.u32 %v628_v37, %v556_v36  ;;  %v561_v43 = vor.u32 %v627_v38, %v558_v39  ;;  %v544_v45 = vld [vmem:[#allocation6 + $0x30] sm:$0xf]  ;;  %v624_v47 = vld [vmem:[#allocation6 + $0x34] sm:$0xf] }
  0x17   :  { %290 = vmatpush.bf16.msra.mxu0 %v581_v24  ;;  %644 = vmatpush.bf16.msra.mxu3 %v581_v24  ;;  %v565_v44 = vor.u32 %v629_v41, %v564_v40  ;;  %v625_v46 = vld [vmem:[#allocation6 + $0x38] sm:$0xf0]  ;;  %v546_v48 = vld [vmem:[#allocation6 + $0x3c] sm:$0xf0]  ;;  %v552_v49 = vld [vmem:[#allocation6 + $0x38] sm:$0xf] }
  0x18   :  { %319 = vmatpush.bf16.msra.mxu1 %v585_v25  ;;  %v626_v50 = vld [vmem:[#allocation6 + $0x40] sm:$0xf0]  ;;  %v545_v51 = vor.u32 %v625_v46, %v544_v45  ;;  %v549_v52 = vor.u32 %v624_v47, %v546_v48  ;;  %v532_v54 = vld [vmem:[#allocation6 + $0x18] sm:$0xf]  ;;  %v621_v56 = vld [vmem:[#allocation6 + $0x1c] sm:$0xf] }
  0x19   :  { %348 = vmatpush.bf16.msra.mxu2 %v589_v26  ;;  %v553_v53 = vor.u32 %v626_v50, %v552_v49  ;;  %v622_v55 = vld [vmem:[#allocation6 + $0x20] sm:$0xf0]  ;;  %v534_v57 = vld [vmem:[#allocation6 + $0x24] sm:$0xf0]  ;;  %v540_v58 = vld [vmem:[#allocation6 + $0x20] sm:$0xf] }
  0x1a   :  { %v623_v59 = vld [vmem:[#allocation6 + $0x28] sm:$0xf0]  ;;  %v533_v60 = vor.u32 %v622_v55, %v532_v54  ;;  %v537_v61 = vor.u32 %v621_v56, %v534_v57  ;;  %v520_v63 = vld [vmem:[#allocation6] sm:$0xf]  ;;  %v618_v1 = vld [vmem:[#allocation6 + $0x4] sm:$0xf] }
  0x1b   :  { %291 = vmatpush.bf16.msra.mxu0 %v569_v33  ;;  %645 = vmatpush.bf16.msra.mxu3 %v569_v33  ;;  %v541_v62 = vor.u32 %v623_v59, %v540_v58  ;;  %v619_v0 = vld [vmem:[#allocation6 + $0x8] sm:$0xf0]  ;;  %v522_v2 = vld [vmem:[#allocation6 + $0xc] sm:$0xf0]  ;;  %v528_v3 = vld [vmem:[#allocation6 + $0x8] sm:$0xf] }
  0x1c   :  { %320 = vmatpush.bf16.msra.mxu1 %v573_v34  ;;  %v620_v4 = vld [vmem:[#allocation6 + $0x10] sm:$0xf0]  ;;  %v521_v5 = vor.u32 %v619_v0, %v520_v63  ;;  %v525_v6 = vor.u32 %v618_v1, %v522_v2  ;;  %v614_v8 = vld [vmem:[#allocation3] sm:$0xff]  ;;  %v615_v9 = vld [vmem:[#allocation3 + $0x8] sm:$0xff]  ;;  %s741_s0 = smov [#allocation8]   ;;  %s488_s25 = sshll.u32 %s774_s2, 4  ;;  %s489_s25 = int_to_ptr.hbm [resolvable:$true] %s488_s25 }
  0x1d   :  { %349 = vmatpush.bf16.msra.mxu2 %v577_v35  ;;  %v529_v7 = vor.u32 %v620_v4, %v528_v3  ;;  %v616_v10 = vld [vmem:[#allocation3 + $0x10] sm:$0xff]  ;;  %v617_v11 = vld [vmem:[#allocation3 + $0x18] sm:$0xff]  ;;  %s486_s1 = sshll.u32 %s741_s0, 4  ;;  %s487_s1 = int_to_ptr.vmem [resolvable:$true] %s486_s1 }
  0x1f   :  { %292 = vmatpush.bf16.msra.mxu0 %v557_v42  ;;  %646 = vmatpush.bf16.msra.mxu3 %v557_v42 }
  0x20   :  { %321 = vmatpush.bf16.msra.mxu1 %v561_v43 }
  0x21   :  { %350 = vmatpush.bf16.msra.mxu2 %v565_v44 }
  0x23   :  { %293 = vmatpush.bf16.msra.mxu0 %v545_v51  ;;  %647 = vmatpush.bf16.msra.mxu3 %v545_v51 }
  0x24   :  { %322 = vmatpush.bf16.msra.mxu1 %v549_v52 }
  0x25   :  { %351 = vmatpush.bf16.msra.mxu2 %v553_v53 }
  0x27   :  { %294 = vmatpush.bf16.msra.mxu0 %v533_v60  ;;  %648 = vmatpush.bf16.msra.mxu3 %v533_v60 }
  0x28   :  { %323 = vmatpush.bf16.msra.mxu1 %v537_v61 }
  0x29   :  { %352 = vmatpush.bf16.msra.mxu2 %v541_v62 }
  0x2b   :  { %295 = vmatpush.bf16.msra.mxu0 %v521_v5  ;;  %649 = vmatpush.bf16.msra.mxu3 %v521_v5 }
  0x2c   :  { %324 = vmatpush.bf16.msra.mxu1 %v525_v6 }
  0x2d   :  { %353 = vmatpush.bf16.msra.mxu2 %v529_v7 }
  0x2e   :  { %296 = vmatmul.bf16.vlgmr.msra.gmra.mxu0 %v614_v8  ;;  %301 = vmatmul.bf16.vlgmr.msra.gmra.mxu3 %v615_v9 }
  0x2f   :  { %325 = vmatmul.bf16.vlgmr.msra.gmra.mxu1 %v614_v8 }
  0x30   :  { %354 = vmatmul.bf16.vlgmr.msra.gmra.mxu2 %v614_v8 }
  0x3e   :  { %306 = vmatmul.bf16.gmra.mxu3 %v616_v10 }
  0x3f   :  { %330 = vmatmul.bf16.gmra.mxu1 %v615_v9 }
  0x40   :  { %359 = vmatmul.bf16.gmra.mxu2 %v615_v9 }
  0x4e   :  { %311 = vmatmul.bf16.gmra.mxu3 %v617_v11 }
  0x4f   :  { %335 = vmatmul.bf16.gmra.mxu1 %v616_v10 }
  0x50   :  { %364 = vmatmul.bf16.gmra.mxu2 %v616_v10 }
  0x5f   :  { %340 = vmatmul.bf16.gmra.mxu1 %v617_v11 }
  0x60   :  { %369 = vmatmul.bf16.gmra.mxu2 %v617_v11 }
  0xab   :  { %v297_v12 = vpop.f32.mrf.mxu0 }
  0xac   :  { %v326_v13 = vpop.f32.mrf.mxu1 }
  0xad   :  { %v450_v14 = vpack.c.bf16 %v326_v13, %v297_v12 }
  0xaf   :  { %466 = vst [vmem:[#allocation8] sm:$0xff] %v450_v14 }
  0xb1   :  { %v302_v16 = vpop.f32.mrf.mxu3 }
  0xb3   :  { %v355_v15 = vpop.f32.mrf.mxu2  ;;  %v299_v18 = vpop.f32.mrf.mxu0 }
  0xb4   :  { %v451_v17 = vpack.c.bf16 %v355_v15, %v355_v15  ;;  %v328_v19 = vpop.f32.mrf.mxu1 }
  0xb5   :  { %v452_v20 = vpack.c.bf16 %v328_v19, %v299_v18 }
  0xb6   :  { %467 = vst [vmem:[#allocation8 + $0x8] sm:$0xf] %v451_v17 }
  0xb7   :  { %468 = vst [vmem:[#allocation8 + $0xc] sm:$0xff] %v452_v20 }
  0xb9   :  { %v304_v24 = vpop.f32.mrf.mxu3 }
  0xbb   :  { %v357_v21 = vpop.f32.mrf.mxu2 }
  0xbc   :  { %v453_v22 = vpack.c.bf16 %v357_v21, %v357_v21  ;;  %v331_v23 = vpop.f32.mrf.mxu1 }
  0xbd   :  { %v454_v25 = vpack.c.bf16 %v331_v23, %v302_v16 }
  0xbe   :  { %469 = vst [vmem:[#allocation8 + $0x14] sm:$0xf] %v453_v22 }
  0xbf   :  { %470 = vst [vmem:[#allocation8 + $0x18] sm:$0xff] %v454_v25 }
  0xc1   :  { %v307_v30 = vpop.f32.mrf.mxu3 }
  0xc3   :  { %v360_v26 = vpop.f32.mrf.mxu2 }
  0xc4   :  { %v455_v27 = vpack.c.bf16 %v360_v26, %v360_v26  ;;  %v333_v28 = vpop.f32.mrf.mxu1 }
  0xc5   :  { %v456_v29 = vpack.c.bf16 %v333_v28, %v304_v24 }
  0xc6   :  { %471 = vst [vmem:[#allocation8 + $0x20] sm:$0xf] %v455_v27 }
  0xc7   :  { %472 = vst [vmem:[#allocation8 + $0x24] sm:$0xff] %v456_v29 }
  0xc9   :  { %v309_v35 = vpop.f32.mrf.mxu3 }
  0xcb   :  { %v362_v31 = vpop.f32.mrf.mxu2 }
  0xcc   :  { %v457_v32 = vpack.c.bf16 %v362_v31, %v362_v31  ;;  %v336_v33 = vpop.f32.mrf.mxu1 }
  0xcd   :  { %v458_v34 = vpack.c.bf16 %v336_v33, %v307_v30 }
  0xce   :  { %473 = vst [vmem:[#allocation8 + $0x2c] sm:$0xf] %v457_v32 }
  0xcf   :  { %474 = vst [vmem:[#allocation8 + $0x30] sm:$0xff] %v458_v34 }
  0xd1   :  { %v312_v40 = vpop.f32.mrf.mxu3 }
  0xd3   :  { %v365_v36 = vpop.f32.mrf.mxu2 }
  0xd4   :  { %v459_v37 = vpack.c.bf16 %v365_v36, %v365_v36  ;;  %v338_v38 = vpop.f32.mrf.mxu1 }
  0xd5   :  { %v460_v39 = vpack.c.bf16 %v338_v38, %v309_v35 }
  0xd6   :  { %475 = vst [vmem:[#allocation8 + $0x38] sm:$0xf] %v459_v37 }
  0xd7   :  { %476 = vst [vmem:[#allocation8 + $0x3c] sm:$0xff] %v460_v39 }
  0xd9   :  { %v314_v47 = vpop.f32.mrf.mxu3 }
  0xdb   :  { %v367_v41 = vpop.f32.mrf.mxu2 }
  0xdc   :  { %v461_v42 = vpack.c.bf16 %v367_v41, %v367_v41  ;;  %v341_v43 = vpop.f32.mrf.mxu1 }
  0xdd   :  { %v462_v44 = vpack.c.bf16 %v341_v43, %v312_v40 }
  0xde   :  { %477 = vst [vmem:[#allocation8 + $0x44] sm:$0xf] %v461_v42 }
  0xdf   :  { %478 = vst [vmem:[#allocation8 + $0x48] sm:$0xff] %v462_v44 }
  0xe3   :  { %v370_v45 = vpop.f32.mrf.mxu2 }
  0xe4   :  { %v463_v46 = vpack.c.bf16 %v370_v45, %v370_v45  ;;  %v343_v48 = vpop.f32.mrf.mxu1 }
  0xe5   :  { %v464_v49 = vpack.c.bf16 %v343_v48, %v314_v47 }
  0xe6   :  { %479 = vst [vmem:[#allocation8 + $0x50] sm:$0xf] %v463_v46 }
  0xe7   :  { %480 = vst [vmem:[#allocation8 + $0x54] sm:$0xff] %v464_v49 }
  0xeb   :  { %v372_v50 = vpop.f32.mrf.mxu2 }
  0xec   :  { %v465_v51 = vpack.c.bf16 %v372_v50, %v372_v50 }
  0xee   :  { %481 = vst [vmem:[#allocation8 + $0x5c] sm:$0xf] %v465_v51 }
  0xef   :  { %494 = dma.vmem_to_hbm [thread:$0]  %s487_s1, 1536, %s489_s25, [#allocation5], %s739_s21, %s739_s21, %s740_s22  }
  0xf0   :  { %733 = dma.done.wait [#allocation5], 1536  }
  0xf1   :  { %734 = vsyncadd [#allocation5], 4294965760 }
  0xf2   :  { %499 = vsyncpa [#allocation4], 1 }
  0xf3   :  { %500 = vsyncpa [#allocation7], 1 }
  0xf4   :  { %501 = vsyncpa [#allocation5], 1 }

</bundles_post_ra>
